<compile_context>
chip_gen: v7x
topology: tpu7x:2x2x1
jax: 0.10.0
libtpu: 0.0.40
codegen_flags: <defaults>
</compile_context>

<pallas_src>
import jax
import jax.numpy as jnp
from jax.experimental import pallas as pl
from jax.experimental.pallas import tpu as pltpu


def block_kernel(x_ref, w1_ref, b1_ref, w2_ref, b2_ref, o_ref):
    x = x_ref[...]                                                    # (TM, in_N)
    # Hidden layer: Linear -> ReLU  (MXU matmul, f32 accumulation).
    h = jnp.dot(x, w1_ref[...], preferred_element_type=jnp.float32)  # (TM, width) f32
    h = jnp.maximum(h + b1_ref[...], 0.0)                            # bias (1, width) broadcasts
    # Output layer: Linear -> ReLU. Cast hidden back to weight dtype (no-op for f32,
    # keeps the 2nd matmul on the fast bf16 MXU path when running in bf16).
    y = jnp.dot(h.astype(w2_ref.dtype), w2_ref[...],
                preferred_element_type=jnp.float32)                  # (TM, out_N) f32
    y = jnp.maximum(y + b2_ref[...], 0.0)
    # Residual connection, done in f32 before the final downcast.
    o_ref[...] = (y + x.astype(jnp.float32)).astype(o_ref.dtype)


def block_forward(x, w1, b1, w2, b2, *, tm=None):
    """x: (N, in_N); w1: (in_N, width); b1: (1, width); w2: (width, out_N); b2: (1, out_N).

    Biases are kept in float32 regardless of activation/weight dtype.
    """
    N, in_N = x.shape
    width = w1.shape[1]
    out_N = w2.shape[1]
    assert out_N == in_N, "residual connection requires out_N == in_N"

    # Batch tile: multiple of 8 (sublane), capped so double-buffered input+output
    # tiles stay far below even v5e's 16 MiB scoped-VMEM default
    # (TM=2048, D=32, f32 -> 256 KiB per buffer).
    if tm is None:
        tm = min(2048, max(8, ((N + 7) // 8) * 8))
    assert tm % 8 == 0, "batch tile must be a multiple of 8 (sublane)"

    # Pad ragged N up to a multiple of TM; padded rows are discarded at the end.
    n_pad = pl.cdiv(N, tm) * tm
    x_in = x if n_pad == N else jnp.pad(x, ((0, n_pad - N), (0, 0)))

    b1 = b1.astype(jnp.float32)
    b2 = b2.astype(jnp.float32)

    out = pl.pallas_call(
        block_kernel,
        out_shape=jax.ShapeDtypeStruct((n_pad, out_N), x.dtype),
        grid_spec=pl.GridSpec(
            grid=(n_pad // tm,),
            in_specs=[
                pl.BlockSpec((tm, in_N), lambda i: (i, 0)),      # activation tile: marches over N
                pl.BlockSpec((in_N, width), lambda i: (0, 0)),   # weights/biases: VMEM-resident
                pl.BlockSpec((1, width), lambda i: (0, 0)),
                pl.BlockSpec((width, out_N), lambda i: (0, 0)),
                pl.BlockSpec((1, out_N), lambda i: (0, 0)),
            ],
            out_specs=pl.BlockSpec((tm, out_N), lambda i: (i, 0)),
        ),
        compiler_params=pltpu.CompilerParams(
            dimension_semantics=("parallel",)),                   # megacore-shard the batch axis
    )(x_in, w1, b1, w2, b2)

    return out[:N] if n_pad != N else out


def reference_forward(x, w1, b1, w2, b2):
    xf = x.astype(jnp.float32)
    h = jnp.maximum(xf @ w1.astype(jnp.float32) + b1.astype(jnp.float32), 0.0)
    y = jnp.maximum(h @ w2.astype(jnp.float32) + b2.astype(jnp.float32), 0.0)
    return y + xf


if __name__ == "__main__":
    # Shapes consistent with the module: in_N = out_N (residual), width = hidden.
    N, in_N, width, out_N = 512, 32, 32, 32

    key = jax.random.PRNGKey(0)
    kx, k1, k2, k3, k4 = jax.random.split(key, 5)

    x = jax.random.normal(kx, (N, in_N), dtype=jnp.float32)
    # Deterministic parameter init (uniform, roughly PyTorch's default bound 1/sqrt(fan_in)).
    w1 = jax.random.uniform(k1, (in_N, width), jnp.float32,
                            minval=-1.0 / jnp.sqrt(in_N), maxval=1.0 / jnp.sqrt(in_N))
    b1 = jax.random.uniform(k2, (1, width), jnp.float32,
                            minval=-1.0 / jnp.sqrt(in_N), maxval=1.0 / jnp.sqrt(in_N))
    w2 = jax.random.uniform(k3, (width, out_N), jnp.float32,
                            minval=-1.0 / jnp.sqrt(width), maxval=1.0 / jnp.sqrt(width))
    b2 = jax.random.uniform(k4, (1, out_N), jnp.float32,
                            minval=-1.0 / jnp.sqrt(width), maxval=1.0 / jnp.sqrt(width))

    # 1) f32, tiled batch (grid of 4 steps with TM=128).
    out = block_forward(x, w1, b1, w2, b2, tm=128)
    jax.block_until_ready(out)
    ref = reference_forward(x, w1, b1, w2, b2)
    assert out.shape == (N, out_N)
    assert jnp.allclose(out, ref, atol=1e-5, rtol=1e-5), "f32 mismatch vs reference"

    # 2) Ragged N (exercises the padding path / non-divisible grid).
    N2 = 500
    out2 = block_forward(x[:N2], w1, b1, w2, b2, tm=128)
    jax.block_until_ready(out2)
    assert out2.shape == (N2, out_N)
    assert jnp.allclose(out2, ref[:N2], atol=1e-5, rtol=1e-5), "ragged-N mismatch"

    # 3) bf16 activations/weights (f32 accumulation + f32 residual inside the kernel).
    xb, w1b, w2b = (a.astype(jnp.bfloat16) for a in (x, w1, w2))
    out_bf16 = block_forward(xb, w1b, b1, w2b, b2, tm=128)
    jax.block_until_ready(out_bf16)
    ref_bf16 = reference_forward(xb, w1b, b1, w2b, b2)
    assert out_bf16.dtype == jnp.bfloat16
    assert jnp.allclose(out_bf16.astype(jnp.float32), ref_bf16, atol=1e-1, rtol=1e-1), \
        "bf16 mismatch vs reference"

    print("KERNEL_OK")
</pallas_src>

<mosaic_0001>
module attributes {stable_mosaic.version = 11 : i64} {
  func.func @block_kernel(%arg0: i32, %arg1: memref<128x32xf32, #tpu.memory_space<vmem>>, %arg2: memref<32x32xf32, #tpu.memory_space<vmem>>, %arg3: memref<1x32xf32, #tpu.memory_space<vmem>>, %arg4: memref<32x32xf32, #tpu.memory_space<vmem>>, %arg5: memref<1x32xf32, #tpu.memory_space<vmem>>, %arg6: memref<128x32xf32, #tpu.memory_space<vmem>>) attributes {dimension_semantics = [#tpu.dimension_semantics<parallel>], iteration_bounds = array<i64: 4>, scalar_prefetch = 0 : i64, scratch_operands = 0 : i64, tpu.core_type = #tpu.core_type<tc>, window_params = [{transform_indices = @transform_0, window_bounds = array<i64: 128, 32>}, {pipeline_mode = #tpu.pipeline_mode<synchronous>, transform_indices = @transform_1, window_bounds = array<i64: 32, 32>}, {pipeline_mode = #tpu.pipeline_mode<synchronous>, transform_indices = @transform_2, window_bounds = array<i64: 1, 32>}, {pipeline_mode = #tpu.pipeline_mode<synchronous>, transform_indices = @transform_3, window_bounds = array<i64: 32, 32>}, {pipeline_mode = #tpu.pipeline_mode<synchronous>, transform_indices = @transform_4, window_bounds = array<i64: 1, 32>}, {transform_indices = @transform_5, window_bounds = array<i64: 128, 32>}]} {
    %c0 = arith.constant 0 : index
    %c0_0 = arith.constant 0 : index
    %0 = vector.load %arg1[%c0, %c0_0] : memref<128x32xf32, #tpu.memory_space<vmem>>, vector<128x32xf32>
    %c0_1 = arith.constant 0 : index
    %c0_2 = arith.constant 0 : index
    %1 = vector.load %arg2[%c0_1, %c0_2] : memref<32x32xf32, #tpu.memory_space<vmem>>, vector<32x32xf32>
    %cst = arith.constant dense<0.000000e+00> : vector<128x32xf32>
    %2 = tpu.matmul %0, %1, %cst {dimension_numbers = #tpu.dot_dimension_numbers<[1], [0], [0], [1], [0, 0, 1, 1], [], []>} : vector<128x32xf32>, vector<32x32xf32>, vector<128x32xf32> -> vector<128x32xf32>
    %c0_3 = arith.constant 0 : index
    %c0_4 = arith.constant 0 : index
    %3 = vector.load %arg3[%c0_3, %c0_4] : memref<1x32xf32, #tpu.memory_space<vmem>>, vector<1x32xf32>
    %4 = vector.broadcast %3 : vector<1x32xf32> to vector<128x32xf32>
    %5 = arith.addf %2, %4 : vector<128x32xf32>
    %cst_5 = arith.constant 0.000000e+00 : f32
    %6 = vector.broadcast %cst_5 : f32 to vector<128x32xf32>
    %7 = arith.maximumf %5, %6 : vector<128x32xf32>
    %c0_6 = arith.constant 0 : index
    %c0_7 = arith.constant 0 : index
    %8 = vector.load %arg4[%c0_6, %c0_7] : memref<32x32xf32, #tpu.memory_space<vmem>>, vector<32x32xf32>
    %cst_8 = arith.constant dense<0.000000e+00> : vector<128x32xf32>
    %9 = tpu.matmul %7, %8, %cst_8 {dimension_numbers = #tpu.dot_dimension_numbers<[1], [0], [0], [1], [0, 0, 1, 1], [], []>} : vector<128x32xf32>, vector<32x32xf32>, vector<128x32xf32> -> vector<128x32xf32>
    %c0_9 = arith.constant 0 : index
    %c0_10 = arith.constant 0 : index
    %10 = vector.load %arg5[%c0_9, %c0_10] : memref<1x32xf32, #tpu.memory_space<vmem>>, vector<1x32xf32>
    %11 = vector.broadcast %10 : vector<1x32xf32> to vector<128x32xf32>
    %12 = arith.addf %9, %11 : vector<128x32xf32>
    %cst_11 = arith.constant 0.000000e+00 : f32
    %13 = vector.broadcast %cst_11 : f32 to vector<128x32xf32>
    %14 = arith.maximumf %12, %13 : vector<128x32xf32>
    %15 = arith.addf %14, %0 : vector<128x32xf32>
    %c0_12 = arith.constant 0 : index
    %c0_13 = arith.constant 0 : index
    %16 = vector.load %arg6[%c0_12, %c0_13] : memref<128x32xf32, #tpu.memory_space<vmem>>, vector<128x32xf32>
    tpu.vector_store %arg6[%c0_12, %c0_13], %15 {strides = array<i32>} : memref<128x32xf32, #tpu.memory_space<vmem>>, vector<128x32xf32>,
    return
  }
  func.func @transform_0(%arg0: i32) -> (i32, i32) {
    %c0_i32 = arith.constant 0 : i32
    %c0_i32_0 = arith.constant 0 : i32
    return %arg0, %c0_i32 : i32, i32
  }
  func.func @transform_1(%arg0: i32) -> (i32, i32) {
    %c0_i32 = arith.constant 0 : i32
    %c0_i32_0 = arith.constant 0 : i32
    %c0_i32_1 = arith.constant 0 : i32
    return %c0_i32, %c0_i32_0 : i32, i32
  }
  func.func @transform_2(%arg0: i32) -> (i32, i32) {
    %c0_i32 = arith.constant 0 : i32
    %c0_i32_0 = arith.constant 0 : i32
    %c0_i32_1 = arith.constant 0 : i32
    return %c0_i32, %c0_i32_0 : i32, i32
  }
  func.func @transform_3(%arg0: i32) -> (i32, i32) {
    %c0_i32 = arith.constant 0 : i32
    %c0_i32_0 = arith.constant 0 : i32
    %c0_i32_1 = arith.constant 0 : i32
    return %c0_i32, %c0_i32_0 : i32, i32
  }
  func.func @transform_4(%arg0: i32) -> (i32, i32) {
    %c0_i32 = arith.constant 0 : i32
    %c0_i32_0 = arith.constant 0 : i32
    %c0_i32_1 = arith.constant 0 : i32
    return %c0_i32, %c0_i32_0 : i32, i32
  }
  func.func @transform_5(%arg0: i32) -> (i32, i32) {
    %c0_i32 = arith.constant 0 : i32
    %c0_i32_0 = arith.constant 0 : i32
    return %arg0, %c0_i32 : i32, i32
  }
}

</mosaic_0001>

<bundles_post_ra>
// kernel: tpu_custom_call.1
= control target key start
LH: loop header
LB: loop body
LE: loop exit
PB: predicated region body
PF: predicated region fallthrough
CT: control target
= control target key end

     0   :  { %s984_s18 = smov 0   ;;  %s1204_s0 = inlined_call_operand.vmem [shape: f32[512,32], index: 0, kind: input, shape index: {}]   ;;  %s1205_s1 = inlined_call_operand.vmem [shape: f32[32,32], index: 1, kind: input, shape index: {}]   ;;  %s1206_s2 = inlined_call_operand.vmem [shape: f32[1,32], index: 2, kind: input, shape index: {}]   ;;  %s1207_s3 = inlined_call_operand.vmem [shape: f32[32,32], index: 3, kind: input, shape index: {}]   ;;  %s1208_s4 = inlined_call_operand.vmem [shape: f32[1,32], index: 4, kind: input, shape index: {}]   ;;  %s1209_s5 = inlined_call_operand.vmem [shape: f32[512,32], index: 5, kind: output, shape index: {}]  }
   0x1 LB: > { %s773_s19 = sadd.s32 4294967295, %s952_s18   ;;  %p777_p0 = scmp.ge.s32.totalorder %s952_s18, 1  ;;  %s952_s18 = sphi %s984_s18, %s15_s18  }
   0x2   : > { %p188_p1 = scmp.lt.s32.totalorder %s952_s18, 5 }
   0x4   : > { %p189_p2 = pnand %p777_p0, %p188_p1 }
   0x5   : > { %v244_v0 = vld [vmem:[%s1205_s1] sm:$0xff] (!%p189_p2)  ;;  %v245_v1 = vld [vmem:[%s1205_s1 + $0x8] sm:$0xff] (!%p189_p2)  ;;  %v246_v2 = vld [vmem:[%s1205_s1 + $0x10] sm:$0xff] (!%p189_p2)  ;;  %s778_s26 = sshll.u32 (!%p189_p2), %s773_s19, 4  ;;  %vm255_vm0 = vcmask (!%p189_p2), 261120  }
   0x6   : > { %192 = sbr.rel (%p189_p2) target bundleno = 484 (0x1e4), region = 40  ;;  %v922_v3 = vpack.c.bf16 (!%p189_p2), %v245_v1, %v244_v0  ;;  %v247_v4 = vld [vmem:[%s1205_s1 + $0x18] sm:$0xff] (!%p189_p2)  ;;  %p217_p3 = scmp.lt.s32.totalorder (!%p189_p2), %s778_s26, 63  ;;  %v465_v5 = vld [vmem:[%s1207_s3] sm:$0xff] (!%p189_p2)  ;;  %v466_v6 = vld [vmem:[%s1207_s3 + $0x8] sm:$0xff] (!%p189_p2) }
   0x7   : > { %v926_v7 = vpack.c.bf16 (!%p189_p2), %v247_v4, %v246_v2  ;;  %v930_v8 = vpack.c.bf16 (!%p189_p2), %v466_v6, %v465_v5  ;;  %v467_v25 = vld [vmem:[%s1207_s3 + $0x10] sm:$0xff] (!%p189_p2)  ;;  %v468_v26 = vld [vmem:[%s1207_s3 + $0x18] sm:$0xff] (!%p189_p2)  ;;  %v782_v28 = vld [vmem:[%s1206_s2] ss:$0 sm:$0xff] (!%p189_p2) }
   0x8   : > { %923 = vmatprep.subr.bf16.mxu0 (!%p189_p2), %v922_v3  ;;  %v934_v27 = vpack.c.bf16 (!%p189_p2), %v468_v26, %v467_v25 }
   0x9   : > { %925 = vmatpush3.bf16.msra.mxu0 (!%p189_p2), %v922_v3  ;;  %931 = vmatprep.subr.bf16.mxu1 (!%p189_p2), %v930_v8 }
   0xa   : > { %927 = vmatprep.subr.bf16.mxu0 (!%p189_p2), %v926_v7  ;;  %933 = vmatpush3.bf16.msra.mxu1 (!%p189_p2), %v930_v8 }
   0xb   : > { %935 = vmatprep.subr.bf16.mxu1 (!%p189_p2), %v934_v27 }
   0xd   : > { %s1211_s26 = smov (!%p217_p3, %s778_s26), 63  ;;  %929 = vmatpush3.bf16.msra.mxu0 %v926_v7 }
   0xe   : > { %s779_s8 = sshll.u32 %s1211_s26, 3  ;;  %937 = vmatpush3.bf16.msra.mxu1 %v934_v27 }
   0xf   : > { %s1018_s11 = scalar_lea.vmem %s1204_s0, %s779_s8  ;;  %s1137_s23 = scalar_lea.vmem %s1209_s5, %s779_s8 }
  0x10   : > { %v1021_v9 = vld [vmem:[%s1018_s11] sm:$0xff]  ;;  %v1026_v10 = vld [vmem:[%s1018_s11 + $0x8] sm:$0xff]  ;;  %v1029_v11 = vld [vmem:[%s1018_s11 + $0x10] sm:$0xff] }
  0x11   : > { %866 = vmatprep.mubr.msk.f32.mxu0 %vm255_vm0, %v1021_v9  ;;  %v1036_v12 = vld [vmem:[%s1018_s11 + $0x18] sm:$0xff]  ;;  %v1039_v13 = vld [vmem:[%s1018_s11 + $0x20] sm:$0xff]  ;;  %v1046_v14 = vld [vmem:[%s1018_s11 + $0x28] sm:$0xff] }
  0x12   : > { %867 = vmatmul.mubr.msk.f32.vlgmr.msra.gmra.mrb[0].mxu0 %vm255_vm0, %v1026_v10  ;;  %v1049_v15 = vld [vmem:[%s1018_s11 + $0x30] sm:$0xff]  ;;  %v1056_v16 = vld [vmem:[%s1018_s11 + $0x38] sm:$0xff]  ;;  %v1059_v17 = vld [vmem:[%s1018_s11 + $0x40] sm:$0xff] }
  0x13   : > { %869 = vmatprep.mubr.msk.f32.mxu0 %vm255_vm0, %v1029_v11  ;;  %v1066_v18 = vld [vmem:[%s1018_s11 + $0x48] sm:$0xff]  ;;  %v1069_v19 = vld [vmem:[%s1018_s11 + $0x50] sm:$0xff]  ;;  %v1076_v20 = vld [vmem:[%s1018_s11 + $0x58] sm:$0xff] }
  0x14   : > { %v1079_v21 = vld [vmem:[%s1018_s11 + $0x60] sm:$0xff]  ;;  %v1086_v22 = vld [vmem:[%s1018_s11 + $0x68] sm:$0xff]  ;;  %v1089_v23 = vld [vmem:[%s1018_s11 + $0x70] sm:$0xff] }
  0x15   : > { %v1096_v24 = vld [vmem:[%s1018_s11 + $0x78] sm:$0xff] }
  0x16   : > { %870 = vmatmul.mubr.msk.f32.gmra.mrb[2].mxu0 %vm255_vm0, %v1036_v12 }
  0x17   : > { %872 = vmatprep.mubr.msk.f32.mxu0 %vm255_vm0, %v1039_v13 }
  0x1a   : > { %873 = vmatmul.mubr.msk.f32.gmra.mrb[4].mxu0 %vm255_vm0, %v1046_v14 }
  0x1b   : > { %875 = vmatprep.mubr.msk.f32.mxu0 %vm255_vm0, %v1049_v15 }
  0x1e   : > { %876 = vmatmul.mubr.msk.f32.gmra.mrb[6].mxu0 %vm255_vm0, %v1056_v16 }
  0x1f   : > { %878 = vmatprep.mubr.msk.f32.mxu0 %vm255_vm0, %v1059_v17 }
  0x22   : > { %879 = vmatmul.mubr.msk.f32.gmra.mrb[8].mxu0 %vm255_vm0, %v1066_v18 }
  0x23   : > { %881 = vmatprep.mubr.msk.f32.mxu0 %vm255_vm0, %v1069_v19 }
  0x26   : > { %882 = vmatmul.mubr.msk.f32.gmra.mrb[10].mxu0 %vm255_vm0, %v1076_v20 }
  0x27   : > { %884 = vmatprep.mubr.msk.f32.mxu0 %vm255_vm0, %v1079_v21 }
  0x2a   : > { %885 = vmatmul.mubr.msk.f32.gmra.mrb[12].mxu0 %vm255_vm0, %v1086_v22 }
  0x2b   : > { %887 = vmatprep.mubr.msk.f32.mxu0 %vm255_vm0, %v1089_v23 }
  0x2e   : > { %888 = vmatmul.mubr.msk.f32.gmra.mrb[14].mxu0 %vm255_vm0, %v1096_v24 }
  0xe5   : > { %v868_v29 = vpop.f32.mrb[0].mxu0 }
  0xe6   : > { %v376_v30 = vadd.f32 %v868_v29, %v782_v28  ;;  %v370_v31 = vpop.f32.mrb[1].mxu0 }
  0xe7   : > { %v371_v32 = vadd.f32 %v782_v28, %v370_v31 }
  0xe8   : > { %v450_v35 = vmax.f32 %v376_v30, 0.0  ;;  %v1128_v30 = vld [vmem:[%s1208_s4] ss:$0 sm:$0xff] }
  0xe9   : > { %v449_v33 = vmax.f32 %v371_v32, 0.0  ;;  %v871_v34 = vpop.f32.mrb[2].mxu0 }
  0xea   : > { %v386_v36 = vadd.f32 %v871_v34, %v782_v28  ;;  %v380_v37 = vpop.f32.mrb[3].mxu0 }
  0xeb   : > { %v381_v38 = vadd.f32 %v782_v28, %v380_v37  ;;  %898 = vmatprep.mubr.msk.f32.mxu1 %vm255_vm0, %v449_v33 }
  0xec   : > { %899 = vmatmul.mubr.msk.f32.vlgmr.msra.gmra.mrb[0].mxu1 %vm255_vm0, %v450_v35  ;;  %v452_v41 = vmax.f32 %v386_v36, 0.0 }
  0xed   : > { %v451_v39 = vmax.f32 %v381_v38, 0.0  ;;  %v874_v40 = vpop.f32.mrb[4].mxu0 }
  0xee   : > { %v396_v42 = vadd.f32 %v874_v40, %v782_v28  ;;  %v390_v43 = vpop.f32.mrb[5].mxu0 }
  0xef   : > { %v391_v44 = vadd.f32 %v782_v28, %v390_v43  ;;  %901 = vmatprep.mubr.msk.f32.mxu1 %vm255_vm0, %v451_v39 }
  0xf0   : > { %902 = vmatmul.mubr.msk.f32.gmra.mrb[2].mxu1 %vm255_vm0, %v452_v41  ;;  %v454_v47 = vmax.f32 %v396_v42, 0.0 }
  0xf1   : > { %v453_v45 = vmax.f32 %v391_v44, 0.0  ;;  %v877_v46 = vpop.f32.mrb[6].mxu0 }
  0xf2   : > { %v406_v48 = vadd.f32 %v877_v46, %v782_v28  ;;  %v400_v49 = vpop.f32.mrb[7].mxu0 }
  0xf3   : > { %v401_v50 = vadd.f32 %v782_v28, %v400_v49  ;;  %904 = vmatprep.mubr.msk.f32.mxu1 %vm255_vm0, %v453_v45 }
  0xf4   : > { %905 = vmatmul.mubr.msk.f32.gmra.mrb[4].mxu1 %vm255_vm0, %v454_v47  ;;  %v456_v53 = vmax.f32 %v406_v48, 0.0 }
  0xf5   : > { %v455_v51 = vmax.f32 %v401_v50, 0.0  ;;  %v880_v52 = vpop.f32.mrb[8].mxu0 }
  0xf6   : > { %v416_v54 = vadd.f32 %v880_v52, %v782_v28  ;;  %v410_v55 = vpop.f32.mrb[9].mxu0 }
  0xf7   : > { %v411_v56 = vadd.f32 %v782_v28, %v410_v55  ;;  %907 = vmatprep.mubr.msk.f32.mxu1 %vm255_vm0, %v455_v51 }
  0xf8   : > { %908 = vmatmul.mubr.msk.f32.gmra.mrb[6].mxu1 %vm255_vm0, %v456_v53  ;;  %v458_v59 = vmax.f32 %v416_v54, 0.0 }
  0xf9   : > { %v457_v57 = vmax.f32 %v411_v56, 0.0  ;;  %v883_v58 = vpop.f32.mrb[10].mxu0 }
  0xfa   : > { %v426_v60 = vadd.f32 %v883_v58, %v782_v28  ;;  %v420_v61 = vpop.f32.mrb[11].mxu0 }
  0xfb   : > { %v421_v62 = vadd.f32 %v782_v28, %v420_v61  ;;  %910 = vmatprep.mubr.msk.f32.mxu1 %vm255_vm0, %v457_v57 }
  0xfc   : > { %911 = vmatmul.mubr.msk.f32.gmra.mrb[8].mxu1 %vm255_vm0, %v458_v59  ;;  %v460_v1 = vmax.f32 %v426_v60, 0.0 }
  0xfd   : > { %v459_v63 = vmax.f32 %v421_v62, 0.0  ;;  %v886_v0 = vpop.f32.mrb[12].mxu0 }
  0xfe   : > { %v436_v2 = vadd.f32 %v886_v0, %v782_v28  ;;  %v430_v3 = vpop.f32.mrb[13].mxu0 }
  0xff   : > { %v431_v4 = vadd.f32 %v782_v28, %v430_v3  ;;  %913 = vmatprep.mubr.msk.f32.mxu1 %vm255_vm0, %v459_v63 }
 0x100   : > { %914 = vmatmul.mubr.msk.f32.gmra.mrb[10].mxu1 %vm255_vm0, %v460_v1  ;;  %v462_v7 = vmax.f32 %v436_v2, 0.0 }
 0x101   : > { %v461_v5 = vmax.f32 %v431_v4, 0.0  ;;  %v889_v6 = vpop.f32.mrb[14].mxu0 }
 0x102   : > { %v446_v8 = vadd.f32 %v889_v6, %v782_v28  ;;  %v440_v25 = vpop.f32.mrb[15].mxu0 }
 0x103   : > { %v441_v26 = vadd.f32 %v782_v28, %v440_v25  ;;  %916 = vmatprep.mubr.msk.f32.mxu1 %vm255_vm0, %v461_v5 }
 0x104   : > { %917 = vmatmul.mubr.msk.f32.gmra.mrb[12].mxu1 %vm255_vm0, %v462_v7  ;;  %v464_v29 = vmax.f32 %v446_v8, 0.0 }
 0x105   : > { %v463_v27 = vmax.f32 %v441_v26, 0.0 }
 0x107   : > { %919 = vmatprep.mubr.msk.f32.mxu1 %vm255_vm0, %v463_v27 }
 0x108   : > { %920 = vmatmul.mubr.msk.f32.gmra.mrb[14].mxu1 %vm255_vm0, %v464_v29 }
 0x1bf   : > { %v900_v31 = vpop.f32.mrb[0].mxu1 }
 0x1c0   : > { %v596_v32 = vadd.f32 %v900_v31, %v1128_v30  ;;  %v590_v33 = vpop.f32.mrb[1].mxu1 }
 0x1c1   : > { %v591_v28 = vadd.f32 %v1128_v30, %v590_v33 }
 0x1c2   : > { %v670_v34 = vmax.f32 %v596_v32, 0.0 }
 0x1c3   : > { %v669_v35 = vmax.f32 %v591_v28, 0.0  ;;  %v903_v36 = vpop.f32.mrb[2].mxu1 }
 0x1c4   : > { %v686_v37 = vadd.f32 %v670_v34, %v1026_v10  ;;  %v606_v38 = vadd.f32 %v903_v36, %v1128_v30  ;;  %v600_v39 = vpop.f32.mrb[3].mxu1 }
 0x1c5   : > { %v685_v40 = vadd.f32 %v669_v35, %v1021_v9  ;;  %v601_v41 = vadd.f32 %v1128_v30, %v600_v39 }
 0x1c6   : > { %702 = vst.msk [vmem:[%s1137_s23 + $0x8] sm:$0xff] %vm255_vm0, %v686_v37  ;;  %v672_v42 = vmax.f32 %v606_v38, 0.0 }
 0x1c7   : > { %701 = vst.msk [vmem:[%s1137_s23] sm:$0xff] %vm255_vm0, %v685_v40  ;;  %v671_v43 = vmax.f32 %v601_v41, 0.0  ;;  %v906_v44 = vpop.f32.mrb[4].mxu1 }
 0x1c8   : > { %v688_v45 = vadd.f32 %v672_v42, %v1036_v12  ;;  %v616_v10 = vadd.f32 %v906_v44, %v1128_v30  ;;  %v610_v46 = vpop.f32.mrb[5].mxu1 }
 0x1c9   : > { %v687_v47 = vadd.f32 %v671_v43, %v1029_v11  ;;  %v611_v9 = vadd.f32 %v1128_v30, %v610_v46 }
 0x1ca   : > { %704 = vst.msk [vmem:[%s1137_s23 + $0x18] sm:$0xff] %vm255_vm0, %v688_v45  ;;  %v674_v48 = vmax.f32 %v616_v10, 0.0 }
 0x1cb   : > { %703 = vst.msk [vmem:[%s1137_s23 + $0x10] sm:$0xff] %vm255_vm0, %v687_v47  ;;  %v673_v49 = vmax.f32 %v611_v9, 0.0  ;;  %v909_v50 = vpop.f32.mrb[6].mxu1 }
 0x1cc   : > { %v690_v51 = vadd.f32 %v674_v48, %v1046_v14  ;;  %v626_v12 = vadd.f32 %v909_v50, %v1128_v30  ;;  %v620_v52 = vpop.f32.mrb[7].mxu1 }
 0x1cd   : > { %v689_v53 = vadd.f32 %v673_v49, %v1039_v13  ;;  %v621_v11 = vadd.f32 %v1128_v30, %v620_v52 }
 0x1ce   : > { %706 = vst.msk [vmem:[%s1137_s23 + $0x28] sm:$0xff] %vm255_vm0, %v690_v51  ;;  %v676_v54 = vmax.f32 %v626_v12, 0.0 }
 0x1cf   : > { %705 = vst.msk [vmem:[%s1137_s23 + $0x20] sm:$0xff] %vm255_vm0, %v689_v53  ;;  %v675_v55 = vmax.f32 %v621_v11, 0.0  ;;  %v912_v56 = vpop.f32.mrb[8].mxu1 }
 0x1d0   : > { %v692_v57 = vadd.f32 %v676_v54, %v1056_v16  ;;  %v636_v14 = vadd.f32 %v912_v56, %v1128_v30  ;;  %v630_v58 = vpop.f32.mrb[9].mxu1 }
 0x1d1   : > { %v691_v59 = vadd.f32 %v675_v55, %v1049_v15  ;;  %v631_v13 = vadd.f32 %v1128_v30, %v630_v58 }
 0x1d2   : > { %708 = vst.msk [vmem:[%s1137_s23 + $0x38] sm:$0xff] %vm255_vm0, %v692_v57  ;;  %v678_v60 = vmax.f32 %v636_v14, 0.0 }
 0x1d3   : > { %707 = vst.msk [vmem:[%s1137_s23 + $0x30] sm:$0xff] %vm255_vm0, %v691_v59  ;;  %v677_v61 = vmax.f32 %v631_v13, 0.0  ;;  %v915_v62 = vpop.f32.mrb[10].mxu1 }
 0x1d4   : > { %v694_v63 = vadd.f32 %v678_v60, %v1066_v18  ;;  %v646_v16 = vadd.f32 %v915_v62, %v1128_v30  ;;  %v640_v0 = vpop.f32.mrb[11].mxu1 }
 0x1d5   : > { %v693_v1 = vadd.f32 %v677_v61, %v1059_v17  ;;  %v641_v15 = vadd.f32 %v1128_v30, %v640_v0 }
 0x1d6   : > { %710 = vst.msk [vmem:[%s1137_s23 + $0x48] sm:$0xff] %vm255_vm0, %v694_v63  ;;  %v680_v2 = vmax.f32 %v646_v16, 0.0 }
 0x1d7   : > { %709 = vst.msk [vmem:[%s1137_s23 + $0x40] sm:$0xff] %vm255_vm0, %v693_v1  ;;  %v679_v3 = vmax.f32 %v641_v15, 0.0  ;;  %v918_v4 = vpop.f32.mrb[12].mxu1 }
 0x1d8   : > { %v696_v5 = vadd.f32 %v680_v2, %v1076_v20  ;;  %v656_v18 = vadd.f32 %v918_v4, %v1128_v30  ;;  %v650_v6 = vpop.f32.mrb[13].mxu1 }
 0x1d9   : > { %v695_v7 = vadd.f32 %v679_v3, %v1069_v19  ;;  %v651_v17 = vadd.f32 %v1128_v30, %v650_v6 }
 0x1da   : > { %712 = vst.msk [vmem:[%s1137_s23 + $0x58] sm:$0xff] %vm255_vm0, %v696_v5  ;;  %v682_v8 = vmax.f32 %v656_v18, 0.0 }
 0x1db   : > { %711 = vst.msk [vmem:[%s1137_s23 + $0x50] sm:$0xff] %vm255_vm0, %v695_v7  ;;  %v681_v25 = vmax.f32 %v651_v17, 0.0  ;;  %v921_v26 = vpop.f32.mrb[14].mxu1 }
 0x1dc   : > { %v698_v27 = vadd.f32 %v682_v8, %v1086_v22  ;;  %v666_v20 = vadd.f32 %v921_v26, %v1128_v30  ;;  %v660_v29 = vpop.f32.mrb[15].mxu1 }
 0x1dd   : > { %v697_v31 = vadd.f32 %v681_v25, %v1079_v21  ;;  %v661_v19 = vadd.f32 %v1128_v30, %v660_v29 }
 0x1de   : > { %714 = vst.msk [vmem:[%s1137_s23 + $0x68] sm:$0xff] %vm255_vm0, %v698_v27  ;;  %v684_v32 = vmax.f32 %v666_v20, 0.0 }
 0x1df   : > { %713 = vst.msk [vmem:[%s1137_s23 + $0x60] sm:$0xff] %vm255_vm0, %v697_v31  ;;  %v683_v33 = vmax.f32 %v661_v19, 0.0 }
 0x1e0   : > { %v700_v28 = vadd.f32 %v684_v32, %v1096_v24 }
 0x1e1   : > { %v699_v34 = vadd.f32 %v683_v33, %v1089_v23 }
 0x1e2   : > { %716 = vst.msk [vmem:[%s1137_s23 + $0x78] sm:$0xff] %vm255_vm0, %v700_v28 }
 0x1e3   : > { %715 = vst.msk [vmem:[%s1137_s23 + $0x70] sm:$0xff] %vm255_vm0, %v699_v34 }
 0x1e4 PF: > { %s15_s18 = sadd.s32 1, %s952_s18  }
 0x1e5   : > { %p12_p4 = scmp.ge.s32.totalorder %s15_s18, 6  }
 0x1e7   :  { %14 = sbr.rel (!%p12_p4) target bundleno = 1 (0x1), region = 70 }

</bundles_post_ra>
